<compile_context>
chip_gen: v7x
topology: tpu7x:2x2x1
jax: 0.10.0
libtpu: 0.0.40
codegen_flags: <defaults>
</compile_context>

<pallas_src>
import jax
import jax.numpy as jnp
from jax.experimental import pallas as pl
from jax.experimental.pallas import tpu as pltpu


def conv_im2col_relu_kernel(p_ref, w_ref, b_ref, o_ref):
    """One image: fused im2col 3x3 conv + bias + ReLU.

    p_ref: (1, 9*Cin, H*W)  bf16 im2col patches (lane-dense spatial axis)
    w_ref: (Cout, 9*Cin)    bf16 reshaped conv weights
    b_ref: (Cout, 1)        f32 bias (column vector, broadcast across lanes)
    o_ref: (1, Cout, H*W)   output, channel-first == NCHW flattened over space
    """
    # Single MXU contraction, f32 accumulation.
    acc = jnp.dot(w_ref[...], p_ref[0], preferred_element_type=jnp.float32)
    acc = jnp.maximum(acc + b_ref[...], 0.0)          # bias + ReLU in f32
    o_ref[0, :, :] = acc.astype(o_ref.dtype)          # lane-dense (Cout, H*W) store


def subpixel_conv(x_nchw, weight_oihw, bias, upscale_factor=2,
                  matmul_dtype=jnp.bfloat16):
    """Matches torch SubPixelConv.forward on NCHW input."""
    N, Cin, H, W = x_nchw.shape
    Cout = weight_oihw.shape[0]           # Cin * r^2
    r = upscale_factor
    assert Cout == Cin * r * r
    K = 9 * Cin
    HW = H * W

    # --- im2col in the wrapper (channel-first K ordering: cin, kh, kw) ------
    x_pad = jnp.pad(x_nchw, ((0, 0), (0, 0), (1, 1), (1, 1)))
    taps = [x_pad[:, :, kh:kh + H, kw:kw + W]
            for kh in range(3) for kw in range(3)]          # 9 x (N, Cin, H, W)
    patches = jnp.stack(taps, axis=2)                       # (N, Cin, 9, H, W)
    patches = patches.reshape(N, K, HW).astype(matmul_dtype)

    # torch weight (Cout, Cin, 3, 3) -> (Cout, Cin*9); col idx = cin*9 + kh*3 + kw
    w2 = weight_oihw.reshape(Cout, K).astype(matmul_dtype)
    b2 = bias.reshape(Cout, 1).astype(jnp.float32)

    out_dtype = x_nchw.dtype
    cost = pl.CostEstimate(
        flops=2 * N * HW * Cout * K,
        transcendentals=0,
        bytes_accessed=(patches.size * patches.dtype.itemsize
                        + w2.size * w2.dtype.itemsize
                        + b2.size * 4
                        + N * Cout * HW * jnp.dtype(out_dtype).itemsize),
    )

    y = pl.pallas_call(
        conv_im2col_relu_kernel,
        out_shape=jax.ShapeDtypeStruct((N, Cout, HW), out_dtype),
        grid=(N,),
        in_specs=[
            pl.BlockSpec((1, K, HW), lambda n: (n, 0, 0)),   # per-image patches
            pl.BlockSpec((Cout, K), lambda n: (0, 0)),       # shared weights
            pl.BlockSpec((Cout, 1), lambda n: (0, 0)),       # shared bias
        ],
        out_specs=pl.BlockSpec((1, Cout, HW), lambda n: (n, 0, 0)),
        compiler_params=pltpu.CompilerParams(dimension_semantics=("parallel",)),
        cost_estimate=cost,
    )(patches, w2, b2)

    # Kernel output is already NCHW (flattened spatial) -> only PixelShuffle glue left.
    # PixelShuffle: (N, C*r^2, H, W) -> (N, C, H*r, W*r)
    C = Cout // (r * r)
    y = y.reshape(N, C, r, r, H, W)
    y = jnp.transpose(y, (0, 1, 4, 2, 5, 3))
    return y.reshape(N, C, H * r, W * r)


def _reference(x_nchw, weight_oihw, bias, upscale_factor=2):
    """Pure-JAX f32 reference matching torch semantics (for verification)."""
    N, Cin, H, W = x_nchw.shape
    Cout = weight_oihw.shape[0]
    r = upscale_factor
    y = jax.lax.conv_general_dilated(
        x_nchw, weight_oihw, window_strides=(1, 1), padding="SAME",
        dimension_numbers=("NCHW", "OIHW", "NCHW"),
    ) + bias[None, :, None, None]
    y = jnp.maximum(y, 0.0)
    C = Cout // (r * r)
    y = y.reshape(N, C, r, r, H, W)
    y = jnp.transpose(y, (0, 1, 4, 2, 5, 3))
    return y.reshape(N, C, H * r, W * r)


if __name__ == "__main__":
    # Small shapes consistent with the module: batch=2, in_channels=4, spatial=16.
    N, Cin, H, W = 2, 4, 16, 16
    r = 2
    Cout = Cin * r * r

    key = jax.random.PRNGKey(0)
    kx, kw, kb = jax.random.split(key, 3)
    x = jax.random.normal(kx, (N, Cin, H, W), dtype=jnp.float32)
    # Deterministic synthetic parameters (shapes match nn.Conv2d(Cin, Cin*r^2, 3, padding=1)).
    fan_in = Cin * 3 * 3
    weight = jax.random.normal(kw, (Cout, Cin, 3, 3), dtype=jnp.float32) / jnp.sqrt(fan_in)
    bias = jax.random.normal(kb, (Cout,), dtype=jnp.float32) * 0.1

    out = subpixel_conv(x, weight, bias, upscale_factor=r)
    out = jax.block_until_ready(out)

    ref = _reference(x, weight, bias, upscale_factor=r)
    assert out.shape == (N, Cin, H * r, W * r)
    # bf16 MXU operands with f32 accumulation -> tolerance in the bf16 class.
    assert jnp.allclose(out, ref, atol=5e-2, rtol=5e-2)

    print("KERNEL_OK")
</pallas_src>

<mosaic_0001>
module attributes {stable_mosaic.version = 11 : i64} {
  func.func @conv_im2col_relu_kernel(%arg0: i32, %arg1: memref<1x36x256xbf16, #tpu.memory_space<vmem>>, %arg2: memref<16x36xbf16, #tpu.memory_space<vmem>>, %arg3: memref<16x1xf32, #tpu.memory_space<vmem>>, %arg4: memref<1x16x256xf32, #tpu.memory_space<vmem>>) attributes {dimension_semantics = [#tpu.dimension_semantics<parallel>], iteration_bounds = array<i64: 2>, scalar_prefetch = 0 : i64, scratch_operands = 0 : i64, tpu.core_type = #tpu.core_type<tc>, window_params = [{transform_indices = @transform_0, window_bounds = array<i64: 1, 36, 256>}, {pipeline_mode = #tpu.pipeline_mode<synchronous>, transform_indices = @transform_1, window_bounds = array<i64: 16, 36>}, {pipeline_mode = #tpu.pipeline_mode<synchronous>, transform_indices = @transform_2, window_bounds = array<i64: 16, 1>}, {transform_indices = @transform_3, window_bounds = array<i64: 1, 16, 256>}]} {
    %c0 = arith.constant 0 : index
    %c0_0 = arith.constant 0 : index
    %0 = vector.load %arg2[%c0, %c0_0] : memref<16x36xbf16, #tpu.memory_space<vmem>>, vector<16x36xbf16>
    %c0_1 = arith.constant 0 : index
    %c0_2 = arith.constant 0 : index
    %c0_3 = arith.constant 0 : index
    %1 = vector.load %arg1[%c0_1, %c0_2, %c0_3] : memref<1x36x256xbf16, #tpu.memory_space<vmem>>, vector<1x36x256xbf16>
    %2 = vector.shape_cast %1 : vector<1x36x256xbf16> to vector<36x256xbf16>
    %cst = arith.constant dense<0.000000e+00> : vector<16x256xf32>
    %3 = tpu.matmul %0, %2, %cst {dimension_numbers = #tpu.dot_dimension_numbers<[1], [0], [0], [1], [0, 0, 1, 1], [], []>} : vector<16x36xbf16>, vector<36x256xbf16>, vector<16x256xf32> -> vector<16x256xf32>
    %c0_4 = arith.constant 0 : index
    %c0_5 = arith.constant 0 : index
    %4 = vector.load %arg3[%c0_4, %c0_5] : memref<16x1xf32, #tpu.memory_space<vmem>>, vector<16x1xf32>
    %5 = vector.broadcast %4 : vector<16x1xf32> to vector<16x256xf32>
    %6 = arith.addf %3, %5 : vector<16x256xf32>
    %cst_6 = arith.constant 0.000000e+00 : f32
    %7 = vector.broadcast %cst_6 : f32 to vector<16x256xf32>
    %8 = arith.maximumf %6, %7 : vector<16x256xf32>
    %c0_7 = arith.constant 0 : index
    %c0_8 = arith.constant 0 : index
    %c0_9 = arith.constant 0 : index
    %9 = vector.load %arg4[%c0_7, %c0_8, %c0_9] : memref<1x16x256xf32, #tpu.memory_space<vmem>>, vector<1x16x256xf32>
    %10 = vector.shape_cast %9 : vector<1x16x256xf32> to vector<16x256xf32>
    %11 = vector.shape_cast %8 : vector<16x256xf32> to vector<1x16x256xf32>
    tpu.vector_store %arg4[%c0_7, %c0_8, %c0_9], %11 {strides = array<i32>} : memref<1x16x256xf32, #tpu.memory_space<vmem>>, vector<1x16x256xf32>,
    return
  }
  func.func @transform_0(%arg0: i32) -> (i32, i32, i32) {
    %c0_i32 = arith.constant 0 : i32
    %c0_i32_0 = arith.constant 0 : i32
    %c0_i32_1 = arith.constant 0 : i32
    return %arg0, %c0_i32, %c0_i32_0 : i32, i32, i32
  }
  func.func @transform_1(%arg0: i32) -> (i32, i32) {
    %c0_i32 = arith.constant 0 : i32
    %c0_i32_0 = arith.constant 0 : i32
    %c0_i32_1 = arith.constant 0 : i32
    return %c0_i32, %c0_i32_0 : i32, i32
  }
  func.func @transform_2(%arg0: i32) -> (i32, i32) {
    %c0_i32 = arith.constant 0 : i32
    %c0_i32_0 = arith.constant 0 : i32
    %c0_i32_1 = arith.constant 0 : i32
    return %c0_i32, %c0_i32_0 : i32, i32
  }
  func.func @transform_3(%arg0: i32) -> (i32, i32, i32) {
    %c0_i32 = arith.constant 0 : i32
    %c0_i32_0 = arith.constant 0 : i32
    %c0_i32_1 = arith.constant 0 : i32
    return %arg0, %c0_i32, %c0_i32_0 : i32, i32, i32
  }
}

</mosaic_0001>

<bundles_post_ra>
// kernel: tpu_custom_call.1
= control target key start
LH: loop header
LB: loop body
LE: loop exit
PB: predicated region body
PF: predicated region fallthrough
CT: control target
= control target key end

     0   :  { %8 = vsyncpa [#allocation3], 0  ;;  %s631_s0 = inlined_call_operand.vmem [shape: bf16[2,36,256], index: 0, kind: input, shape index: {}]   ;;  %s632_s1 = inlined_call_operand.vmem [shape: bf16[16,36], index: 1, kind: input, shape index: {}]   ;;  %s633_s2 = inlined_call_operand.vmem [shape: f32[16,1], index: 2, kind: input, shape index: {}]   ;;  %s634_s3 = inlined_call_operand.hbm [shape: f32[2,16,256], index: 3, kind: output, shape index: {}]  }
   0x1   :  { %10 = vsyncpa [#allocation3 + $0x1], 0  ;;  %s519_s12 = smov 0   ;;  %s521_s13 = smov 0  }
   0x2   :  { %s523_s14 = smov 0   ;;  %s525_s15 = smov 0  }
   0x3 LB: > { %s540_s16 = sadd.s32 4294967295, %s493_s15   ;;  %s357_s17 = sadd.s32 4294967294, %s493_s15   ;;  %s493_s15 = sphi %s525_s15, %s640_s15   ;;  %s489_s14 = sphi %s523_s14, %s639_s14   ;;  %s485_s13 = sphi %s521_s13, %s638_s13   ;;  %s481_s12 = sphi %s519_s12, %s637_s12  }
   0x4   : > { %s544_s18 = sadd.s32 1, %s493_s15   ;;  %s91_s19 = sadd.s32 1, %s489_s14 }
   0x5   : > { %s88_s20 = ssub.s32 %s493_s15, %s544_s18  ;;  %p101_p0 = scmp.ne.s32.totalorder %s489_s14, %s485_s13 }
   0x6   : > { %p89_p1 = scmp.eq.s32.totalorder %s88_s20, 0  ;;  %p102_p2 = scmp.eq.s32.totalorder %s540_s16, 1 }
   0x7   : > { %p107_p3 = scmp.ne.s32.totalorder %s485_s13, %s481_s12  ;;  %p108_p4 = scmp.eq.s32.totalorder %s357_s17, 1 }
   0x8   : > { %s555_s21 = scalar_select %p89_p1, %s489_s14, %s91_s19  }
   0x9   : > { %p557_p5 = por %p102_p2, %p101_p0  ;;  %p561_p6 = por %p108_p4, %p107_p3 }
   0xa   : > { %p360_p7 = scmp.ge.s32.totalorder %s493_s15, 1  ;;  %p140_p8 = scmp.lt.s32.totalorder %s493_s15, 3 }
   0xc   : > { %p141_p9 = pnand %p360_p7, %p140_p8 }
   0xd   : > { %p164_p10 = scmp.lt.s32.totalorder (!%p141_p9), %s540_s16, 1  ;;  %v495_v0 = vmov (!%p141_p9), 0   ;;  %v177_v1 = vld [vmem:[%s633_s2] sm:$0xff] (!%p141_p9)  ;;  %v178_v2 = vld [vmem:[%s633_s2 + $0x8] sm:$0xff] (!%p141_p9)  ;;  %vm223_vm0 = vcmask (!%p141_p9), 1041408   ;;  %vm219_vm1 = vcmask (!%p141_p9), 293888  }
   0xe   : > { %144 = sbr.rel (%p141_p9) target bundleno = 273 (0x111), region = 32  ;;  %262 = vmatprep.mubr.bf16.mxu0 (!%p141_p9), %v495_v0  ;;  %421 = vset.pattern.permute.xlu0 (!%p141_p9), %v495_v0  ;;  %v430_v11 = vld [vmem:[%s632_s1] sm:$0xff] (!%p141_p9)   ;;  %s161_s8 = sand.u32 (!%p141_p9), 1, %s485_s13  }
   0xf   : > { %181 = vperm.xlu0 (!%p141_p9), %421, %v177_v1   ;;  %s361_s9 = sshll.u32 (!%p141_p9), %s161_s8, 5  ;;  %s377_s17 = sshll.u32 (!%p141_p9), %s540_s16, 9 }
  0x10   : > { %s163_s10 = scalar_lea.vmem (!%p141_p9), [#allocation2], %s361_s9  ;;  %s588_s24 = scalar_lea.hbm (!%p141_p9), %s634_s3, %s377_s17 }
  0x11   : > { %s295_s11 = sshll.u32 (!%p141_p9), %s163_s10, 4  ;;  %s583_s11 = int_to_ptr.vmem [resolvable:$true] %s295_s11 }
  0x12   : > { %s431_s25 = scalar_lea.vmem (!%p141_p9), %s583_s11, 512 }
  0x13   : > { %186 = vperm.xlu0 (!%p141_p9), %421, %v178_v2   ;;  %p432_p11 = scmp.ne.s32.totalorder (!%p141_p9), %s583_s11, %s431_s25 }
  0x15   : > { %s165_s26 = scalar_select %p164_p10, %s540_s16, 1 }
  0x16   : > { %s590_s16 = scalar_lea.sflag [#allocation3], %s161_s8  ;;  %p433_p12 = pnand %p432_p11, %p557_p5 }
  0x17   : > { %s378_s29 = smul.u32 40, %s165_s26  ;;  %s496_s26 = smov [#allocation2]  }
  0x18   : > { %p434_p13 = pneg %p433_p12  ;;  %s435_s27 = sshll.u32 %s496_s26, 4  ;;  %s436_s27 = int_to_ptr.vmem [resolvable:$false] %s435_s27 }
  0x19   : > { %s168_s5 = scalar_lea.vmem %s631_s0, %s378_s29  ;;  %s437_s28 = scalar_lea.vmem %s436_s27, 1024 }
  0x1a   : > { %v422_v3 = vld [vmem:[%s168_s5 + $0x4] ss:$8 sps:$4 sm:$0xff]   ;;  %v424_v4 = vld [vmem:[%s168_s5] ss:$8 sps:$4 sm:$0xff]   ;;  %v425_v5 = vld [vmem:[%s168_s5 + $0x14] ss:$8 sps:$4 sm:$0xff]   ;;  %p438_p0 = scmp.lt.s32.totalorder %s583_s11, %s436_s27  ;;  %p439_p1 = scmp.lt.s32.totalorder %s437_s28, %s431_s25 }
  0x1b   : > { %230 = vmatprep.subr.bf16.mxu0 %v422_v3  ;;  %v176_v6 = vld [vmem:[%s168_s5 + $0x20] sm:$0x33]  ;;  %v427_v7 = vld [vmem:[%s168_s5 + $0x10] ss:$8 sps:$4 sm:$0xff]  }
  0x1c   : > { %231 = vmatpush1.bf16.msra.mxu0 %v424_v4  ;;  %v369_v8 = vcombine.high %v176_v6, %v176_v6  ;;  %v368_v9 = vcombine.low %v176_v6, %v176_v6  ;;  %p440_p2 = por %p439_p1, %p438_p0 }
  0x1d   : > { %232 = vmatprep.subr.bf16.mxu0 %v425_v5 }
  0x1e   : > { %v225_v10 = vsel %vm223_vm0, %v368_v9, 0  ;;  %p441_p3 = pnand %p440_p2, %p434_p13 }
  0x20   : > { %233 = vmatpush1.bf16.msra.mxu0 %v427_v7 }
  0x21   : > { %370 = vmatprep.subr.msk.bf16.mxu0 %vm223_vm0, %v369_v8 }
  0x24   : > { %235 = vmatpush1.bf16.msra.mxu0 %v225_v10 }
  0x27   : > { %371 = vmatmul.mubr.msk.bf16.vlgmr.msra.gmra.mrb[0].mxu0 %vm219_vm1, %v430_v11 }
  0x8e   : > { %v182_v12 = vpop.permute.xlu0 %181 }
  0x92   : > { %v187_v16 = vpop.permute.xlu0 %186 }
  0xfa   : > { %v264_v13 = vpop.f32.mrb[0].mxu0 }
  0xfb   : > { %v265_v14 = vadd.f32 %v264_v13, %v182_v12  ;;  %v266_v15 = vpop.f32.mrb[1].mxu0 }
  0xfc   : > { %v267_v17 = vadd.f32 %v266_v15, %v182_v12  ;;  %v268_v18 = vpop.f32.mrb[2].mxu0 }
  0xfd   : > { %v273_v19 = vmax.f32 %v265_v14, 0.0  ;;  %v269_v20 = vadd.f32 %v268_v18, %v187_v16  ;;  %v270_v21 = vpop.f32.mrb[3].mxu0 }
  0xfe   : > { %v274_v22 = vmax.f32 %v267_v17, 0.0  ;;  %v271_v23 = vadd.f32 %v270_v21, %v187_v16 }
  0xff   : > { %277 = vst [vmem:[%s163_s10] sm:$0xff] %v273_v19  ;;  %v275_v24 = vmax.f32 %v269_v20, 0.0 }
 0x100   : > { %278 = vst [vmem:[%s163_s10 + $0x8] sm:$0xff] %v274_v22  ;;  %v276_v25 = vmax.f32 %v271_v23, 0.0 }
 0x101   : > { %279 = vst [vmem:[%s163_s10 + $0x10] sm:$0xff] %v275_v24 }
 0x102   : > { %280 = vst [vmem:[%s163_s10 + $0x18] sm:$0xff] %v276_v25 }
 0x103   : > { %444 = shalt.err (!%p441_p3)
}
 0x104   : > { %s445_s29 = scalar_lea.hbm %s588_s24, 512  ;;  %s449_s5 = scalar_lea.hbm %s634_s3, 1024 }
 0x105   : > { %p446_p4 = scmp.ne.s32.totalorder %s588_s24, %s445_s29  ;;  %p450_p9 = scmp.lt.u32.totalorder %s588_s24, %s634_s3 }
 0x106   : > { %p451_p10 = scmp.lt.u32.totalorder %s449_s5, %s445_s29  ;;  %p453_p12 = scmp.lt.u32.totalorder %s445_s29, %s588_s24 }
 0x107   : > { %p447_p7 = pnand %p446_p4, %p557_p5 }
 0x108   : > { %p452_p11 = por %p451_p10, %p450_p9 }
 0x109   : > { %p448_p8 = pneg %p447_p7 }
 0x10a   : > { %p454_p13 = por %p453_p12, %p452_p11 }
 0x10c   : > { %p455_p0 = pnand %p454_p13, %p448_p8 }
 0x10e   : > { %458 = shalt.err (!%p455_p0)
}
 0x10f   : > { %s497_s8 = smov 256   ;;  %s498_s9 = smov 16  }
 0x110   : > { %379 = dma.vmem_to_hbm [thread:$0]  (%p557_p5), %s583_s11, 512, %s588_s24, %s590_s16, %s497_s8, %s497_s8, %s498_s9  }
 0x111 PF: > { %p385_p1 = scmp.ge.s32.totalorder %s493_s15, 2  ;;  %s310_s10 = sand.u32 1, %s481_s12  }
 0x112   : > { %s311_s17 = scalar_lea.sflag [#allocation3], %s310_s10 }
 0x113   : > { %p382_p2 = pnand %p385_p1, %p561_p6 }
 0x115   : > { %476 = dma.done.wait (!%p382_p2), %s311_s17, 512  }
 0x116   : > { %478 = vsyncadd (!%p382_p2), %s311_s17, 4294966784  ;;  %p13_p3 = scmp.ge.s32.totalorder %s544_s18, 4   ;;  %s637_s12 = smov %s485_s13 }
 0x117   : > { %s638_s13 = smov %s489_s14  ;;  %s639_s14 = smov %s555_s21 }
 0x118   : > { %s640_s15 = smov %s544_s18  ;;  %15 = sbr.rel (!%p13_p3) target bundleno = 3 (0x3), region = 67 }
 0x11f   :  { %316 = vsyncpa [#allocation3], 1 }
 0x120   :  { %318 = vsyncpa [#allocation3 + $0x1], 1 }

</bundles_post_ra>
